<compile_context>
chip_gen: v7x
topology: tpu7x:2x2x1
jax: 0.10.0
libtpu: 0.0.40
codegen_flags: <defaults>
</compile_context>

<pallas_src>
import jax
import jax.numpy as jnp
from jax.experimental import pallas as pl
from jax.experimental.pallas import tpu as pltpu


_LANE_CANDIDATES = (4096, 2048, 1024, 512, 256, 128)


def _sigmoid_kernel(x_ref, o_ref):
    # Compute in f32 in-register (safe/fast on all generations), store in the
    # output dtype.  Compute-side tweaks are invisible under the HBM roofline.
    x = x_ref[...].astype(jnp.float32)
    o_ref[...] = jax.nn.sigmoid(x).astype(o_ref.dtype)


def _choose_layout(n: int, itemsize: int):
    """Pick (lanes, rows, block_rows, padded) for a flat length-n tensor."""
    # dtype-aware sublane packing: 8 rows (f32), 16 (bf16/f16), 32 (int8/fp8).
    sublane = max(8, 32 // max(1, itemsize))

    # Prefer a lane width that divides n exactly -> no jnp.pad on the input and
    # no tail slice on the output (each of those is a full extra HBM round-trip
    # on a purely bandwidth-bound kernel).
    lanes = None
    for cand in _LANE_CANDIDATES:
        if n % cand == 0:
            lanes = cand
            break
    if lanes is None:
        # Fallback padded path: keep lanes wide without over-padding tiny inputs.
        lanes = 128
        for cand in _LANE_CANDIDATES:
            if n >= cand * 8:
                lanes = cand
                break

    padded = pl.cdiv(n, lanes) * lanes
    rows = padded // lanes

    # ~3 MiB per buffer -> (in + out) x double-buffering ~ 12 MiB:
    # fits v5e's 16 MiB default scoped VMEM and v7x's 64 MiB physical VMEM.
    block_budget = 3 * 1024 * 1024
    block_rows = min(rows, max(sublane, block_budget // (lanes * itemsize)))

    # For anything bigger than ~2 MiB, guarantee >= 4 grid steps so v7x can
    # shard the parallel axis across both TensorCores and the pipeline
    # actually overlaps DMA with compute.
    total_bytes = rows * lanes * itemsize
    if total_bytes > (2 << 20):
        min_steps = 4  # 2 TCs (v7x) x 2 steps each for pipelining
        block_rows = min(block_rows, pl.cdiv(rows, min_steps))

    if block_rows < rows:
        # Non-full-extent blocks must obey the (8, 128) tiling constraint;
        # round down to the dtype's sublane pack to avoid relayout.
        block_rows = max(8, (block_rows // sublane) * sublane)
        block_rows = min(block_rows, rows)

    return lanes, rows, block_rows, padded


@jax.jit
def tudui_forward(x: jax.Array) -> jax.Array:
    """Pallas implementation of Tudui.forward: output = sigmoid(input)."""
    orig_shape = x.shape
    dtype = x.dtype
    if not jnp.issubdtype(dtype, jnp.floating):
        raise TypeError(f"tudui_forward expects a floating dtype, got {dtype}")
    n = int(x.size)
    itemsize = jnp.dtype(dtype).itemsize

    lanes, rows, block_rows, padded = _choose_layout(n, itemsize)
    needs_pad = padded != n

    flat = x.reshape(-1)
    if needs_pad:
        flat = jnp.pad(flat, (0, padded - n))
    x2d = flat.reshape(rows, lanes)

    num_steps = pl.cdiv(rows, block_rows)
    grid = (num_steps,)

    in_spec_kwargs = {}
    if num_steps >= 4:
        # Third input buffer absorbs DMA jitter on fast-HBM parts (v7x);
        # footprint stays ~15 MiB with 3 MiB blocks.
        in_spec_kwargs["pipeline_mode"] = pl.Buffered(3)

    compiler_kwargs = dict(
        dimension_semantics=("parallel",),
        vmem_limit_bytes=48 << 20,
    )
    if needs_pad:
        # Let XLA fuse the pad into the Pallas input read instead of
        # materializing a padded copy in HBM.
        compiler_kwargs["allow_input_fusion"] = [True]

    out2d = pl.pallas_call(
        _sigmoid_kernel,
        out_shape=jax.ShapeDtypeStruct((rows, lanes), dtype),
        grid=grid,
        in_specs=[
            pl.BlockSpec((block_rows, lanes), lambda i: (i, 0), **in_spec_kwargs)
        ],
        out_specs=pl.BlockSpec((block_rows, lanes), lambda i: (i, 0)),
        compiler_params=pltpu.CompilerParams(**compiler_kwargs),
        cost_estimate=pl.CostEstimate(
            flops=4 * n, transcendentals=n, bytes_accessed=2 * n * itemsize
        ),
    )(x2d)

    out_flat = out2d.reshape(-1)
    if needs_pad:
        out_flat = out_flat[:n]
    return out_flat.reshape(orig_shape)


if __name__ == "__main__":
    key = jax.random.PRNGKey(0)
    k1, k2 = jax.random.split(key)

    # Shape implied by the module script: input reshaped to (-1, 1, 2, 2).
    x_small = jax.random.normal(k1, (2, 1, 2, 2), dtype=jnp.float32)
    y_small = tudui_forward(x_small)
    jax.block_until_ready(y_small)
    assert y_small.shape == x_small.shape and y_small.dtype == x_small.dtype
    assert jnp.allclose(y_small, jax.nn.sigmoid(x_small), atol=1e-6, rtol=1e-6)

    # A slightly larger case (n divisible by 128 -> exercises the no-pad path).
    x_big = jax.random.normal(k2, (2, 4, 16, 16), dtype=jnp.float32)
    y_big = tudui_forward(x_big)
    jax.block_until_ready(y_big)
    assert y_big.shape == x_big.shape and y_big.dtype == x_big.dtype
    assert jnp.allclose(y_big, jax.nn.sigmoid(x_big), atol=1e-6, rtol=1e-6)

    print("KERNEL_OK")
</pallas_src>

<mosaic_0001>
module attributes {stable_mosaic.version = 11 : i64} {
  func.func @_sigmoid_kernel(%arg0: i32, %arg1: memref<1x128xf32, #tpu.memory_space<vmem>>, %arg2: memref<1x128xf32, #tpu.memory_space<vmem>>) attributes {dimension_semantics = [#tpu.dimension_semantics<parallel>], iteration_bounds = array<i64: 1>, scalar_prefetch = 0 : i64, scratch_operands = 0 : i64, tpu.core_type = #tpu.core_type<tc>, window_params = [{transform_indices = @transform_0, window_bounds = array<i64: 1, 128>}, {transform_indices = @transform_1, window_bounds = array<i64: 1, 128>}]} {
    %c0 = arith.constant 0 : index
    %c0_0 = arith.constant 0 : index
    %0 = vector.load %arg1[%c0, %c0_0] : memref<1x128xf32, #tpu.memory_space<vmem>>, vector<1x128xf32>
    %1 = arith.negf %0 : vector<1x128xf32>
    %2 = math.exp %1 : vector<1x128xf32>
    %cst = arith.constant 1.000000e+00 : f32
    %3 = vector.broadcast %cst : f32 to vector<1x128xf32>
    %4 = arith.addf %3, %2 : vector<1x128xf32>
    %5 = arith.divf %3, %4 : vector<1x128xf32>
    %c0_1 = arith.constant 0 : index
    %c0_2 = arith.constant 0 : index
    %6 = vector.load %arg2[%c0_1, %c0_2] : memref<1x128xf32, #tpu.memory_space<vmem>>, vector<1x128xf32>
    tpu.vector_store %arg2[%c0_1, %c0_2], %5 {strides = array<i32>} : memref<1x128xf32, #tpu.memory_space<vmem>>, vector<1x128xf32>,
    return
  }
  func.func @transform_0(%arg0: i32) -> (i32, i32) {
    %c0_i32 = arith.constant 0 : i32
    %c0_i32_0 = arith.constant 0 : i32
    return %arg0, %c0_i32 : i32, i32
  }
  func.func @transform_1(%arg0: i32) -> (i32, i32) {
    %c0_i32 = arith.constant 0 : i32
    %c0_i32_0 = arith.constant 0 : i32
    return %arg0, %c0_i32 : i32, i32
  }
}

</mosaic_0001>

<bundles_post_ra>
// kernel: tudui_forward.2
= control target key start
LH: loop header
LB: loop body
LE: loop exit
PB: predicated region body
PF: predicated region fallthrough
CT: control target
= control target key end

     0   :  { %s58_s0 = inlined_call_operand.vmem [shape: f32[8], index: 0, kind: input, shape index: {}]   ;;  %s59_s1 = inlined_call_operand.<no memory space> [shape: f32[], index: 1, kind: input, shape index: {}]   ;;  %s60_s2 = inlined_call_operand.vmem [shape: f32[1,128], index: 2, kind: output, shape index: {}]  }
   0x1   :  { %v7_v0 = vstv %s59_s1 }
   0x2   :  { %v10_v1 = vld [vmem:[%s58_s0] sm:$0x1]  ;;  %v11_v2 = vlaneseq }
   0x4   :  { %vm13_vm0 = vcmp.lt.s32.totalorder %v11_v2, 8 }
   0x5   :  { %v14_v3 = vsel %vm13_vm0, %v10_v1, %v7_v0 }
   0x6   :  { %16 = vst [vmem:[#allocation7] sm:$0x1] %v14_v3 }
   0xd   :  { %v17_v4 = vld [vmem:[#allocation7] sm:$0x1] }
   0xe   :  { %v29_v5 = vmul.f32 -1.442695, %v17_v4 }
  0x10   :  { %30 = vpow2.f32 %v29_v5 }
  0x1a   :  { %v31_v6 = vpop.eup %30 }
  0x1b   :  { %v21_v7 = vadd.f32 1.0, %v31_v6 }
  0x1d   :  { %32 = vrcp.f32 %v21_v7 }
  0x27   :  { %v33_v8 = vpop.eup %32 }
  0x28   :  { %24 = vst [vmem:[%s60_s2] sm:$0x1] %v33_v8 }

</bundles_post_ra>
